<compile_context>
chip_gen: v6e
topology: v6e:2x2x1
jax: 0.10.0
libtpu: 0.0.40
codegen_flags: <defaults>
</compile_context>

<pallas_src>
import functools
import math

import jax
import jax.numpy as jnp
from jax import lax
from jax.experimental import pallas as pl
from jax.experimental.pallas import tpu as pltpu


def _layer_norm_f32(x_f32, gamma, beta, eps=1e-5):
    """LayerNorm over last dim in fp32 (mirrors the torch LayerNorm subclass)."""
    mean = jnp.mean(x_f32, axis=-1, keepdims=True)
    var = jnp.mean((x_f32 - mean) ** 2, axis=-1, keepdims=True)
    y = (x_f32 - mean) * lax.rsqrt(var + eps)
    return y * gamma.astype(jnp.float32) + beta.astype(jnp.float32)


def _block_kernel(x_ref,
                  ln1_g_ref, ln1_b_ref,
                  w_in_ref, b_in_ref,
                  w_out_ref, b_out_ref,
                  ln2_g_ref, ln2_b_ref,
                  w_fc_ref, b_fc_ref,
                  w_proj_ref, b_proj_ref,
                  o_ref,
                  heads_ref,
                  *, n_head, bt, seq_len, ff_chunk):
    rows, E = x_ref.shape                    # rows = bt * seq_len
    FF = w_fc_ref.shape[1]
    d_head = E // n_head
    scale = 1.0 / math.sqrt(d_head)
    cdt = w_in_ref.dtype                     # MXU compute dtype (== weight dtype)

    x = x_ref[...].astype(jnp.float32)       # (rows, E)

    # ---------------- attention branch ----------------
    h = _layer_norm_f32(x, ln1_g_ref[...], ln1_b_ref[...])
    # Weights are pre-transposed to (in, out): NN-form matmul, f32 accumulation.
    qkv = jnp.dot(h.astype(cdt), w_in_ref[...],
                  preferred_element_type=jnp.float32)          # (rows, 3E)
    qkv = qkv + b_in_ref[...].astype(jnp.float32)

    qf = qkv[:, 0:E] * scale                 # q pre-scaled in f32
    kf = qkv[:, E:2 * E]
    vf = qkv[:, 2 * E:3 * E]

    # Batched head path: one bt-batched matmul pair + one batched softmax per
    # head.  The (rows, dh) -> (bt, L, dh) split is done on the f32 values
    # (8-aligned sublane split -> layout preserving); the cdt cast happens on
    # the already-reshaped per-head block, so no per-(bi, hh) tiny casts.
    batched = (bt == 1) or (seq_len % 8 == 0)

    for hh in range(n_head):
        c = slice(hh * d_head, (hh + 1) * d_head)
        if batched:
            qh = qf[:, c].reshape(bt, seq_len, d_head).astype(cdt)
            kh = kf[:, c].reshape(bt, seq_len, d_head).astype(cdt)
            vh = vf[:, c].reshape(bt, seq_len, d_head).astype(cdt)
            s = lax.dot_general(qh, kh, (((2,), (2,)), ((0,), (0,))),
                                preferred_element_type=jnp.float32)   # (bt,L,L)
            s = s - jnp.max(s, axis=-1, keepdims=True)
            p = jnp.exp(s)
            p = p * pl.reciprocal(jnp.sum(p, axis=-1, keepdims=True),
                                  approx=True)
            oh = lax.dot_general(p.astype(cdt), vh,
                                 (((2,), (1,)), ((0,), (0,))),
                                 preferred_element_type=jnp.float32)  # (bt,L,dh)
            heads_ref[:, c] = oh.reshape(rows, d_head).astype(cdt)
        else:
            # Fallback (seq_len not sublane aligned): per-batch-element loop.
            for bi in range(bt):
                r = slice(bi * seq_len, (bi + 1) * seq_len)
                qh = qf[r, c].astype(cdt)
                kh = kf[r, c].astype(cdt)
                vh = vf[r, c].astype(cdt)
                s = lax.dot_general(qh, kh, (((1,), (1,)), ((), ())),
                                    preferred_element_type=jnp.float32)
                s = s - jnp.max(s, axis=-1, keepdims=True)
                p = jnp.exp(s)
                p = p * pl.reciprocal(jnp.sum(p, axis=-1, keepdims=True),
                                      approx=True)
                heads_ref[r, c] = jnp.dot(p.astype(cdt), vh,
                                          preferred_element_type=jnp.float32
                                          ).astype(cdt)

    # Head-concat output projection: one full-K matmul on the cdt scratch.
    attn = jnp.dot(heads_ref[...], w_out_ref[...],
                   preferred_element_type=jnp.float32)
    attn = attn + b_out_ref[...].astype(jnp.float32)

    x1 = x + attn                                              # residual 1 (f32)

    # ---------------- MLP branch (FF-chunked) ----------------
    h2 = _layer_norm_f32(x1, ln2_g_ref[...], ln2_b_ref[...]).astype(cdt)
    proj = jnp.zeros((rows, E), jnp.float32)
    for c0 in range(0, FF, ff_chunk):
        c1 = min(c0 + ff_chunk, FF)
        fc = jnp.dot(h2, w_fc_ref[:, c0:c1],
                     preferred_element_type=jnp.float32)       # (rows, chunk)
        fc = fc + b_fc_ref[:, c0:c1].astype(jnp.float32)
        g = fc * jax.nn.sigmoid(1.702 * fc)                    # QuickGELU (f32)
        proj = proj + jnp.dot(g.astype(cdt), w_proj_ref[c0:c1, :],
                              preferred_element_type=jnp.float32)
    proj = proj + b_proj_ref[...].astype(jnp.float32)

    o_ref[...] = (x1 + proj).astype(o_ref.dtype)               # residual 2


def _pick_batch_tile(n_batch, seq_len, target_rows=256):
    """Batch elements per grid step.

    bt*seq_len must be sublane aligned (multiple of 8) or cover the whole
    flattened first dim; prefer >= 4 grid steps (2 per v7x TensorCore) so the
    block DMAs overlap compute on both cores, and keep rows near `target_rows`
    so the MXU M dimension is filled without blowing VMEM on activations.
    """
    valid = [d for d in range(1, n_batch + 1)
             if n_batch % d == 0 and ((d * seq_len) % 8 == 0 or d == n_batch)]
    small = [d for d in valid if d * seq_len <= max(target_rows, seq_len)]
    if small:
        for min_steps in (4, 2):
            multi = [d for d in small if n_batch // d >= min_steps]
            if multi:
                return max(multi)
        return max(small)
    return min(valid)


def _vmem_limit_bytes():
    """~75% of physical per-core VMEM (fits v7x's 64 MiB with headroom)."""
    try:
        cap = int(pltpu.get_tpu_info().vmem_capacity_bytes)
    except Exception:
        cap = 64 * 1024 * 1024
    return min(int(cap * 3 // 4), 96 * 1024 * 1024)


def residual_attention_block_batch_major(x_nle, params, n_head,
                                         compute_dtype=jnp.bfloat16):
    """x_nle: (N, L, E) batch-major.  No wrapper transposes (reshape is free)."""
    N, L, E = x_nle.shape
    FF = 4 * E
    cdt = jnp.dtype(compute_dtype)

    xb = x_nle.reshape(N * L, E)             # contiguous -> free reshape

    bt = _pick_batch_tile(N, L)
    rows = bt * L
    ff_chunk = min(FF, 1024)

    def vec(v):                              # 1D param -> (1, D) f32 row
        return jnp.asarray(v, jnp.float32).reshape(1, -1)

    def wT(w):                               # (out, in) -> (in, out), cdt weights
        return jnp.asarray(w, cdt).T

    weight_args = [
        vec(params['ln1_g']), vec(params['ln1_b']),
        wT(params['w_in']),   vec(params['b_in']),
        wT(params['w_out']),  vec(params['b_out']),
        vec(params['ln2_g']), vec(params['ln2_b']),
        wT(params['w_fc']),   vec(params['b_fc']),
        wT(params['w_proj']), vec(params['b_proj']),
    ]

    def full_spec(arr):
        # Constant index_map -> weight is DMA'd once and stays resident.
        return pl.BlockSpec(arr.shape, lambda b: (0, 0))

    out = pl.pallas_call(
        functools.partial(_block_kernel, n_head=n_head, bt=bt, seq_len=L,
                          ff_chunk=ff_chunk),
        out_shape=jax.ShapeDtypeStruct((N * L, E), x_nle.dtype),
        grid_spec=pltpu.PrefetchScalarGridSpec(
            num_scalar_prefetch=0,
            grid=(N // bt,),
            in_specs=[pl.BlockSpec((rows, E), lambda b: (b, 0))] +
                     [full_spec(a) for a in weight_args],
            out_specs=pl.BlockSpec((rows, E), lambda b: (b, 0)),
            scratch_shapes=[pltpu.VMEM((rows, E), cdt)],   # heads in compute dtype
        ),
        compiler_params=pltpu.CompilerParams(
            dimension_semantics=("parallel",),
            vmem_limit_bytes=_vmem_limit_bytes()),
    )(xb, *weight_args)

    return out.reshape(N, L, E)


def residual_attention_block(x, params, n_head, compute_dtype=jnp.bfloat16):
    """x: (L, N, E) seq-major, same convention as PyTorch MultiheadAttention.

    TODO(synk): these two transposes are two extra HBM passes over x; callers
    with batch-major data should use residual_attention_block_batch_major.
    """
    out_nle = residual_attention_block_batch_major(
        jnp.transpose(x, (1, 0, 2)), params, n_head, compute_dtype)
    return jnp.transpose(out_nle, (1, 0, 2))


def _reference(x, p, n_head):
    """Pure-JAX reference mirroring the PyTorch forward (eval mode)."""
    def ln(t, g, b):
        m = t.mean(-1, keepdims=True)
        v = ((t - m) ** 2).mean(-1, keepdims=True)
        return (t - m) / jnp.sqrt(v + 1e-5) * g + b

    L, N, E = x.shape
    dh = E // n_head
    h = ln(x, p['ln1_g'], p['ln1_b'])
    qkv = h @ p['w_in'].T + p['b_in']
    q, k, v = jnp.split(qkv, 3, axis=-1)
    q = q * (dh ** -0.5)

    def heads(t):  # (L,N,E) -> (N,H,L,dh)
        return jnp.transpose(t.reshape(L, N, n_head, dh), (1, 2, 0, 3))

    qh, kh, vh = heads(q), heads(k), heads(v)
    s = jnp.einsum('nhld,nhmd->nhlm', qh, kh)
    a = jax.nn.softmax(s, axis=-1)
    o = jnp.einsum('nhlm,nhmd->nhld', a, vh)
    o = jnp.transpose(o, (2, 0, 1, 3)).reshape(L, N, E)
    x = x + (o @ p['w_out'].T + p['b_out'])

    h2 = ln(x, p['ln2_g'], p['ln2_b'])
    fc = h2 @ p['w_fc'].T + p['b_fc']
    g = fc * jax.nn.sigmoid(1.702 * fc)
    x = x + (g @ p['w_proj'].T + p['b_proj'])
    return x


def init_params(key, d_model):
    FF = 4 * d_model
    ks = jax.random.split(key, 6)
    s = 0.02
    return dict(
        ln1_g=jnp.ones((d_model,), jnp.float32),
        ln1_b=jnp.zeros((d_model,), jnp.float32),
        w_in=s * jax.random.normal(ks[0], (3 * d_model, d_model), jnp.float32),
        b_in=s * jax.random.normal(ks[1], (3 * d_model,), jnp.float32),
        w_out=s * jax.random.normal(ks[2], (d_model, d_model), jnp.float32),
        b_out=jnp.zeros((d_model,), jnp.float32),
        ln2_g=jnp.ones((d_model,), jnp.float32),
        ln2_b=jnp.zeros((d_model,), jnp.float32),
        w_fc=s * jax.random.normal(ks[3], (FF, d_model), jnp.float32),
        b_fc=s * jax.random.normal(ks[4], (FF,), jnp.float32),
        w_proj=s * jax.random.normal(ks[5], (d_model, FF), jnp.float32),
        b_proj=jnp.zeros((d_model,), jnp.float32),
    )


if __name__ == "__main__":
    L, N, E, H = 8, 8, 32, 4           # seq, batch, d_model, n_head
    key = jax.random.PRNGKey(0)
    kx, kp = jax.random.split(key)
    x = jax.random.normal(kx, (L, N, E), jnp.float32)
    params = init_params(kp, E)

    ref = _reference(x, params, H)

    # f32 compute path: tight parity check (only deviation is the EUP
    # approximate reciprocal in the softmax denominator).
    out_f32 = jax.block_until_ready(
        residual_attention_block(x, params, H, compute_dtype=jnp.float32))
    assert out_f32.shape == (L, N, E)
    assert jnp.allclose(out_f32, ref, atol=2e-3, rtol=2e-3), \
        f"f32 path max abs err {jnp.max(jnp.abs(out_f32 - ref))}"

    # bf16 fast path (MXU-native weights, f32 accumulation / LN / softmax):
    # tolerance loosened for bf16 operand rounding.
    out_bf16 = jax.block_until_ready(
        residual_attention_block(x, params, H, compute_dtype=jnp.bfloat16))
    assert out_bf16.shape == (L, N, E)
    assert jnp.allclose(out_bf16, ref, atol=2e-2, rtol=2e-2), \
        f"bf16 path max abs err {jnp.max(jnp.abs(out_bf16 - ref))}"

    print("KERNEL_OK")
</pallas_src>

<mosaic_0001>
module attributes {stable_mosaic.version = 11 : i64} {
  func.func @_block_kernel(%arg0: i32, %arg1: memref<16x32xf32, #tpu.memory_space<vmem>>, %arg2: memref<1x32xf32, #tpu.memory_space<vmem>>, %arg3: memref<1x32xf32, #tpu.memory_space<vmem>>, %arg4: memref<32x96xf32, #tpu.memory_space<vmem>>, %arg5: memref<1x96xf32, #tpu.memory_space<vmem>>, %arg6: memref<32x32xf32, #tpu.memory_space<vmem>>, %arg7: memref<1x32xf32, #tpu.memory_space<vmem>>, %arg8: memref<1x32xf32, #tpu.memory_space<vmem>>, %arg9: memref<1x32xf32, #tpu.memory_space<vmem>>, %arg10: memref<32x128xf32, #tpu.memory_space<vmem>>, %arg11: memref<1x128xf32, #tpu.memory_space<vmem>>, %arg12: memref<128x32xf32, #tpu.memory_space<vmem>>, %arg13: memref<1x32xf32, #tpu.memory_space<vmem>>, %arg14: memref<16x32xf32, #tpu.memory_space<vmem>>, %arg15: memref<16x32xf32, #tpu.memory_space<vmem>>) attributes {dimension_semantics = [#tpu.dimension_semantics<parallel>], iteration_bounds = array<i64: 4>, scalar_prefetch = 0 : i64, scratch_operands = 1 : i64, tpu.core_type = #tpu.core_type<tc>, window_params = [{transform_indices = @transform_0, window_bounds = array<i64: 16, 32>}, {pipeline_mode = #tpu.pipeline_mode<synchronous>, transform_indices = @transform_1, window_bounds = array<i64: 1, 32>}, {pipeline_mode = #tpu.pipeline_mode<synchronous>, transform_indices = @transform_2, window_bounds = array<i64: 1, 32>}, {pipeline_mode = #tpu.pipeline_mode<synchronous>, transform_indices = @transform_3, window_bounds = array<i64: 32, 96>}, {pipeline_mode = #tpu.pipeline_mode<synchronous>, transform_indices = @transform_4, window_bounds = array<i64: 1, 96>}, {pipeline_mode = #tpu.pipeline_mode<synchronous>, transform_indices = @transform_5, window_bounds = array<i64: 32, 32>}, {pipeline_mode = #tpu.pipeline_mode<synchronous>, transform_indices = @transform_6, window_bounds = array<i64: 1, 32>}, {pipeline_mode = #tpu.pipeline_mode<synchronous>, transform_indices = @transform_7, window_bounds = array<i64: 1, 32>}, {pipeline_mode = #tpu.pipeline_mode<synchronous>, transform_indices = @transform_8, window_bounds = array<i64: 1, 32>}, {pipeline_mode = #tpu.pipeline_mode<synchronous>, transform_indices = @transform_9, window_bounds = array<i64: 32, 128>}, {pipeline_mode = #tpu.pipeline_mode<synchronous>, transform_indices = @transform_10, window_bounds = array<i64: 1, 128>}, {pipeline_mode = #tpu.pipeline_mode<synchronous>, transform_indices = @transform_11, window_bounds = array<i64: 128, 32>}, {pipeline_mode = #tpu.pipeline_mode<synchronous>, transform_indices = @transform_12, window_bounds = array<i64: 1, 32>}, {transform_indices = @transform_13, window_bounds = array<i64: 16, 32>}]} {
    %c0 = arith.constant 0 : index
    %c0_0 = arith.constant 0 : index
    %0 = vector.load %arg1[%c0, %c0_0] : memref<16x32xf32, #tpu.memory_space<vmem>>, vector<16x32xf32>
    %c0_1 = arith.constant 0 : index
    %c0_2 = arith.constant 0 : index
    %1 = vector.load %arg2[%c0_1, %c0_2] : memref<1x32xf32, #tpu.memory_space<vmem>>, vector<1x32xf32>
    %c0_3 = arith.constant 0 : index
    %c0_4 = arith.constant 0 : index
    %2 = vector.load %arg3[%c0_3, %c0_4] : memref<1x32xf32, #tpu.memory_space<vmem>>, vector<1x32xf32>
    %cst = arith.constant dense<0.000000e+00> : vector<16xf32>
    %3 = vector.multi_reduction <add>, %0, %cst [1] : vector<16x32xf32> to vector<16xf32>
    %4 = vector.shape_cast %3 : vector<16xf32> to vector<16x1xf32>
    %cst_5 = arith.constant 3.200000e+01 : f32
    %5 = vector.broadcast %cst_5 : f32 to vector<16x1xf32>
    %6 = arith.divf %4, %5 : vector<16x1xf32>
    %7 = vector.broadcast %6 : vector<16x1xf32> to vector<16x32xf32>
    %8 = arith.subf %0, %7 : vector<16x32xf32>
    %9 = arith.mulf %8, %8 : vector<16x32xf32>
    %cst_6 = arith.constant dense<0.000000e+00> : vector<16xf32>
    %10 = vector.multi_reduction <add>, %9, %cst_6 [1] : vector<16x32xf32> to vector<16xf32>
    %11 = vector.shape_cast %10 : vector<16xf32> to vector<16x1xf32>
    %cst_7 = arith.constant 3.200000e+01 : f32
    %12 = vector.broadcast %cst_7 : f32 to vector<16x1xf32>
    %13 = arith.divf %11, %12 : vector<16x1xf32>
    %14 = vector.broadcast %6 : vector<16x1xf32> to vector<16x32xf32>
    %15 = arith.subf %0, %14 : vector<16x32xf32>
    %cst_8 = arith.constant 9.99999974E-6 : f32
    %16 = vector.broadcast %cst_8 : f32 to vector<16x1xf32>
    %17 = arith.addf %13, %16 : vector<16x1xf32>
    %18 = math.rsqrt %17 : vector<16x1xf32>
    %19 = vector.broadcast %18 : vector<16x1xf32> to vector<16x32xf32>
    %20 = arith.mulf %15, %19 : vector<16x32xf32>
    %21 = vector.broadcast %1 : vector<1x32xf32> to vector<16x32xf32>
    %22 = arith.mulf %20, %21 : vector<16x32xf32>
    %23 = vector.broadcast %2 : vector<1x32xf32> to vector<16x32xf32>
    %24 = arith.addf %22, %23 : vector<16x32xf32>
    %c0_9 = arith.constant 0 : index
    %c0_10 = arith.constant 0 : index
    %25 = vector.load %arg4[%c0_9, %c0_10] : memref<32x96xf32, #tpu.memory_space<vmem>>, vector<32x96xf32>
    %cst_11 = arith.constant dense<0.000000e+00> : vector<16x96xf32>
    %26 = tpu.matmul %24, %25, %cst_11 {dimension_numbers = #tpu.dot_dimension_numbers<[1], [0], [0], [1], [0, 0, 1, 1], [], []>} : vector<16x32xf32>, vector<32x96xf32>, vector<16x96xf32> -> vector<16x96xf32>
    %c0_12 = arith.constant 0 : index
    %c0_13 = arith.constant 0 : index
    %27 = vector.load %arg5[%c0_12, %c0_13] : memref<1x96xf32, #tpu.memory_space<vmem>>, vector<1x96xf32>
    %28 = vector.broadcast %27 : vector<1x96xf32> to vector<16x96xf32>
    %29 = arith.addf %26, %28 : vector<16x96xf32>
    %30 = vector.extract_strided_slice %29 {offsets = [0, 0], sizes = [16, 32], strides = [1, 1]} : vector<16x96xf32> to vector<16x32xf32>
    %cst_14 = arith.constant 0.353553385 : f32
    %31 = vector.broadcast %cst_14 : f32 to vector<16x32xf32>
    %32 = arith.mulf %30, %31 : vector<16x32xf32>
    %33 = vector.extract_strided_slice %29 {offsets = [0, 32], sizes = [16, 32], strides = [1, 1]} : vector<16x96xf32> to vector<16x32xf32>
    %34 = vector.extract_strided_slice %29 {offsets = [0, 64], sizes = [16, 32], strides = [1, 1]} : vector<16x96xf32> to vector<16x32xf32>
    %35 = vector.extract_strided_slice %32 {offsets = [0, 0], sizes = [16, 8], strides = [1, 1]} : vector<16x32xf32> to vector<16x8xf32>
    %36 = vector.shape_cast %35 : vector<16x8xf32> to vector<2x8x8xf32>
    %37 = vector.extract_strided_slice %33 {offsets = [0, 0], sizes = [16, 8], strides = [1, 1]} : vector<16x32xf32> to vector<16x8xf32>
    %38 = vector.shape_cast %37 : vector<16x8xf32> to vector<2x8x8xf32>
    %39 = vector.extract_strided_slice %34 {offsets = [0, 0], sizes = [16, 8], strides = [1, 1]} : vector<16x32xf32> to vector<16x8xf32>
    %40 = vector.shape_cast %39 : vector<16x8xf32> to vector<2x8x8xf32>
    %cst_15 = arith.constant dense<0.000000e+00> : vector<2x8x8xf32>
    %41 = tpu.matmul %36, %38, %cst_15 {dimension_numbers = #tpu.dot_dimension_numbers<[2], [2], [1], [1], [0, 0, 0, 1, 1, 1], [0], [0]>} : vector<2x8x8xf32>, vector<2x8x8xf32>, vector<2x8x8xf32> -> vector<2x8x8xf32>
    %cst_16 = arith.constant dense<0xFF800000> : vector<2x8xf32>
    %42 = vector.multi_reduction <maximumf>, %41, %cst_16 [2] : vector<2x8x8xf32> to vector<2x8xf32>
    %43 = vector.shape_cast %42 : vector<2x8xf32> to vector<2x8x1xf32>
    %44 = vector.broadcast %43 : vector<2x8x1xf32> to vector<2x8x8xf32>
    %45 = arith.subf %41, %44 : vector<2x8x8xf32>
    %46 = math.exp %45 : vector<2x8x8xf32>
    %cst_17 = arith.constant dense<0.000000e+00> : vector<2x8xf32>
    %47 = vector.multi_reduction <add>, %46, %cst_17 [2] : vector<2x8x8xf32> to vector<2x8xf32>
    %48 = vector.shape_cast %47 : vector<2x8xf32> to vector<2x8x1xf32>
    %49 = tpu.reciprocal %48 {approx = true} : vector<2x8x1xf32> -> vector<2x8x1xf32>
    %50 = vector.broadcast %49 : vector<2x8x1xf32> to vector<2x8x8xf32>
    %51 = arith.mulf %46, %50 : vector<2x8x8xf32>
    %cst_18 = arith.constant dense<0.000000e+00> : vector<2x8x8xf32>
    %52 = tpu.matmul %51, %40, %cst_18 {dimension_numbers = #tpu.dot_dimension_numbers<[2], [1], [1], [2], [0, 0, 0, 1, 1, 2], [0], [0]>} : vector<2x8x8xf32>, vector<2x8x8xf32>, vector<2x8x8xf32> -> vector<2x8x8xf32>
    %53 = vector.shape_cast %52 : vector<2x8x8xf32> to vector<16x8xf32>
    %c0_19 = arith.constant 0 : index
    %c0_20 = arith.constant 0 : index
    %54 = vector.load %arg15[%c0_19, %c0_20] : memref<16x32xf32, #tpu.memory_space<vmem>>, vector<16x8xf32>
    tpu.vector_store %arg15[%c0_19, %c0_20], %53 {strides = array<i32>} : memref<16x32xf32, #tpu.memory_space<vmem>>, vector<16x8xf32>,
    %55 = vector.extract_strided_slice %32 {offsets = [0, 8], sizes = [16, 8], strides = [1, 1]} : vector<16x32xf32> to vector<16x8xf32>
    %56 = vector.shape_cast %55 : vector<16x8xf32> to vector<2x8x8xf32>
    %57 = vector.extract_strided_slice %33 {offsets = [0, 8], sizes = [16, 8], strides = [1, 1]} : vector<16x32xf32> to vector<16x8xf32>
    %58 = vector.shape_cast %57 : vector<16x8xf32> to vector<2x8x8xf32>
    %59 = vector.extract_strided_slice %34 {offsets = [0, 8], sizes = [16, 8], strides = [1, 1]} : vector<16x32xf32> to vector<16x8xf32>
    %60 = vector.shape_cast %59 : vector<16x8xf32> to vector<2x8x8xf32>
    %cst_21 = arith.constant dense<0.000000e+00> : vector<2x8x8xf32>
    %61 = tpu.matmul %56, %58, %cst_21 {dimension_numbers = #tpu.dot_dimension_numbers<[2], [2], [1], [1], [0, 0, 0, 1, 1, 1], [0], [0]>} : vector<2x8x8xf32>, vector<2x8x8xf32>, vector<2x8x8xf32> -> vector<2x8x8xf32>
    %cst_22 = arith.constant dense<0xFF800000> : vector<2x8xf32>
    %62 = vector.multi_reduction <maximumf>, %61, %cst_22 [2] : vector<2x8x8xf32> to vector<2x8xf32>
    %63 = vector.shape_cast %62 : vector<2x8xf32> to vector<2x8x1xf32>
    %64 = vector.broadcast %63 : vector<2x8x1xf32> to vector<2x8x8xf32>
    %65 = arith.subf %61, %64 : vector<2x8x8xf32>
    %66 = math.exp %65 : vector<2x8x8xf32>
    %cst_23 = arith.constant dense<0.000000e+00> : vector<2x8xf32>
    %67 = vector.multi_reduction <add>, %66, %cst_23 [2] : vector<2x8x8xf32> to vector<2x8xf32>
    %68 = vector.shape_cast %67 : vector<2x8xf32> to vector<2x8x1xf32>
    %69 = tpu.reciprocal %68 {approx = true} : vector<2x8x1xf32> -> vector<2x8x1xf32>
    %70 = vector.broadcast %69 : vector<2x8x1xf32> to vector<2x8x8xf32>
    %71 = arith.mulf %66, %70 : vector<2x8x8xf32>
    %cst_24 = arith.constant dense<0.000000e+00> : vector<2x8x8xf32>
    %72 = tpu.matmul %71, %60, %cst_24 {dimension_numbers = #tpu.dot_dimension_numbers<[2], [1], [1], [2], [0, 0, 0, 1, 1, 2], [0], [0]>} : vector<2x8x8xf32>, vector<2x8x8xf32>, vector<2x8x8xf32> -> vector<2x8x8xf32>
    %73 = vector.shape_cast %72 : vector<2x8x8xf32> to vector<16x8xf32>
    %c0_25 = arith.constant 0 : index
    %c8 = arith.constant 8 : index
    %74 = vector.load %arg15[%c0_25, %c8] : memref<16x32xf32, #tpu.memory_space<vmem>>, vector<16x8xf32>
    tpu.vector_store %arg15[%c0_25, %c8], %73 {strides = array<i32>} : memref<16x32xf32, #tpu.memory_space<vmem>>, vector<16x8xf32>,
    %75 = vector.extract_strided_slice %32 {offsets = [0, 16], sizes = [16, 8], strides = [1, 1]} : vector<16x32xf32> to vector<16x8xf32>
    %76 = vector.shape_cast %75 : vector<16x8xf32> to vector<2x8x8xf32>
    %77 = vector.extract_strided_slice %33 {offsets = [0, 16], sizes = [16, 8], strides = [1, 1]} : vector<16x32xf32> to vector<16x8xf32>
    %78 = vector.shape_cast %77 : vector<16x8xf32> to vector<2x8x8xf32>
    %79 = vector.extract_strided_slice %34 {offsets = [0, 16], sizes = [16, 8], strides = [1, 1]} : vector<16x32xf32> to vector<16x8xf32>
    %80 = vector.shape_cast %79 : vector<16x8xf32> to vector<2x8x8xf32>
    %cst_26 = arith.constant dense<0.000000e+00> : vector<2x8x8xf32>
    %81 = tpu.matmul %76, %78, %cst_26 {dimension_numbers = #tpu.dot_dimension_numbers<[2], [2], [1], [1], [0, 0, 0, 1, 1, 1], [0], [0]>} : vector<2x8x8xf32>, vector<2x8x8xf32>, vector<2x8x8xf32> -> vector<2x8x8xf32>
    %cst_27 = arith.constant dense<0xFF800000> : vector<2x8xf32>
    %82 = vector.multi_reduction <maximumf>, %81, %cst_27 [2] : vector<2x8x8xf32> to vector<2x8xf32>
    %83 = vector.shape_cast %82 : vector<2x8xf32> to vector<2x8x1xf32>
    %84 = vector.broadcast %83 : vector<2x8x1xf32> to vector<2x8x8xf32>
    %85 = arith.subf %81, %84 : vector<2x8x8xf32>
    %86 = math.exp %85 : vector<2x8x8xf32>
    %cst_28 = arith.constant dense<0.000000e+00> : vector<2x8xf32>
    %87 = vector.multi_reduction <add>, %86, %cst_28 [2] : vector<2x8x8xf32> to vector<2x8xf32>
    %88 = vector.shape_cast %87 : vector<2x8xf32> to vector<2x8x1xf32>
    %89 = tpu.reciprocal %88 {approx = true} : vector<2x8x1xf32> -> vector<2x8x1xf32>
    %90 = vector.broadcast %89 : vector<2x8x1xf32> to vector<2x8x8xf32>
    %91 = arith.mulf %86, %90 : vector<2x8x8xf32>
    %cst_29 = arith.constant dense<0.000000e+00> : vector<2x8x8xf32>
    %92 = tpu.matmul %91, %80, %cst_29 {dimension_numbers = #tpu.dot_dimension_numbers<[2], [1], [1], [2], [0, 0, 0, 1, 1, 2], [0], [0]>} : vector<2x8x8xf32>, vector<2x8x8xf32>, vector<2x8x8xf32> -> vector<2x8x8xf32>
    %93 = vector.shape_cast %92 : vector<2x8x8xf32> to vector<16x8xf32>
    %c0_30 = arith.constant 0 : index
    %c16 = arith.constant 16 : index
    %94 = vector.load %arg15[%c0_30, %c16] : memref<16x32xf32, #tpu.memory_space<vmem>>, vector<16x8xf32>
    tpu.vector_store %arg15[%c0_30, %c16], %93 {strides = array<i32>} : memref<16x32xf32, #tpu.memory_space<vmem>>, vector<16x8xf32>,
    %95 = vector.extract_strided_slice %32 {offsets = [0, 24], sizes = [16, 8], strides = [1, 1]} : vector<16x32xf32> to vector<16x8xf32>
    %96 = vector.shape_cast %95 : vector<16x8xf32> to vector<2x8x8xf32>
    %97 = vector.extract_strided_slice %33 {offsets = [0, 24], sizes = [16, 8], strides = [1, 1]} : vector<16x32xf32> to vector<16x8xf32>
    %98 = vector.shape_cast %97 : vector<16x8xf32> to vector<2x8x8xf32>
    %99 = vector.extract_strided_slice %34 {offsets = [0, 24], sizes = [16, 8], strides = [1, 1]} : vector<16x32xf32> to vector<16x8xf32>
    %100 = vector.shape_cast %99 : vector<16x8xf32> to vector<2x8x8xf32>
    %cst_31 = arith.constant dense<0.000000e+00> : vector<2x8x8xf32>
    %101 = tpu.matmul %96, %98, %cst_31 {dimension_numbers = #tpu.dot_dimension_numbers<[2], [2], [1], [1], [0, 0, 0, 1, 1, 1], [0], [0]>} : vector<2x8x8xf32>, vector<2x8x8xf32>, vector<2x8x8xf32> -> vector<2x8x8xf32>
    %cst_32 = arith.constant dense<0xFF800000> : vector<2x8xf32>
    %102 = vector.multi_reduction <maximumf>, %101, %cst_32 [2] : vector<2x8x8xf32> to vector<2x8xf32>
    %103 = vector.shape_cast %102 : vector<2x8xf32> to vector<2x8x1xf32>
    %104 = vector.broadcast %103 : vector<2x8x1xf32> to vector<2x8x8xf32>
    %105 = arith.subf %101, %104 : vector<2x8x8xf32>
    %106 = math.exp %105 : vector<2x8x8xf32>
    %cst_33 = arith.constant dense<0.000000e+00> : vector<2x8xf32>
    %107 = vector.multi_reduction <add>, %106, %cst_33 [2] : vector<2x8x8xf32> to vector<2x8xf32>
    %108 = vector.shape_cast %107 : vector<2x8xf32> to vector<2x8x1xf32>
    %109 = tpu.reciprocal %108 {approx = true} : vector<2x8x1xf32> -> vector<2x8x1xf32>
    %110 = vector.broadcast %109 : vector<2x8x1xf32> to vector<2x8x8xf32>
    %111 = arith.mulf %106, %110 : vector<2x8x8xf32>
    %cst_34 = arith.constant dense<0.000000e+00> : vector<2x8x8xf32>
    %112 = tpu.matmul %111, %100, %cst_34 {dimension_numbers = #tpu.dot_dimension_numbers<[2], [1], [1], [2], [0, 0, 0, 1, 1, 2], [0], [0]>} : vector<2x8x8xf32>, vector<2x8x8xf32>, vector<2x8x8xf32> -> vector<2x8x8xf32>
    %113 = vector.shape_cast %112 : vector<2x8x8xf32> to vector<16x8xf32>
    %c0_35 = arith.constant 0 : index
    %c24 = arith.constant 24 : index
    %114 = vector.load %arg15[%c0_35, %c24] : memref<16x32xf32, #tpu.memory_space<vmem>>, vector<16x8xf32>
    tpu.vector_store %arg15[%c0_35, %c24], %113 {strides = array<i32>} : memref<16x32xf32, #tpu.memory_space<vmem>>, vector<16x8xf32>,
    %c0_36 = arith.constant 0 : index
    %c0_37 = arith.constant 0 : index
    %115 = vector.load %arg15[%c0_36, %c0_37] : memref<16x32xf32, #tpu.memory_space<vmem>>, vector<16x32xf32>
    %c0_38 = arith.constant 0 : index
    %c0_39 = arith.constant 0 : index
    %116 = vector.load %arg6[%c0_38, %c0_39] : memref<32x32xf32, #tpu.memory_space<vmem>>, vector<32x32xf32>
    %cst_40 = arith.constant dense<0.000000e+00> : vector<16x32xf32>
    %117 = tpu.matmul %115, %116, %cst_40 {dimension_numbers = #tpu.dot_dimension_numbers<[1], [0], [0], [1], [0, 0, 1, 1], [], []>} : vector<16x32xf32>, vector<32x32xf32>, vector<16x32xf32> -> vector<16x32xf32>
    %c0_41 = arith.constant 0 : index
    %c0_42 = arith.constant 0 : index
    %118 = vector.load %arg7[%c0_41, %c0_42] : memref<1x32xf32, #tpu.memory_space<vmem>>, vector<1x32xf32>
    %119 = vector.broadcast %118 : vector<1x32xf32> to vector<16x32xf32>
    %120 = arith.addf %117, %119 : vector<16x32xf32>
    %121 = arith.addf %0, %120 : vector<16x32xf32>
    %c0_43 = arith.constant 0 : index
    %c0_44 = arith.constant 0 : index
    %122 = vector.load %arg8[%c0_43, %c0_44] : memref<1x32xf32, #tpu.memory_space<vmem>>, vector<1x32xf32>
    %c0_45 = arith.constant 0 : index
    %c0_46 = arith.constant 0 : index
    %123 = vector.load %arg9[%c0_45, %c0_46] : memref<1x32xf32, #tpu.memory_space<vmem>>, vector<1x32xf32>
    %cst_47 = arith.constant dense<0.000000e+00> : vector<16xf32>
    %124 = vector.multi_reduction <add>, %121, %cst_47 [1] : vector<16x32xf32> to vector<16xf32>
    %125 = vector.shape_cast %124 : vector<16xf32> to vector<16x1xf32>
    %cst_48 = arith.constant 3.200000e+01 : f32
    %126 = vector.broadcast %cst_48 : f32 to vector<16x1xf32>
    %127 = arith.divf %125, %126 : vector<16x1xf32>
    %128 = vector.broadcast %127 : vector<16x1xf32> to vector<16x32xf32>
    %129 = arith.subf %121, %128 : vector<16x32xf32>
    %130 = arith.mulf %129, %129 : vector<16x32xf32>
    %cst_49 = arith.constant dense<0.000000e+00> : vector<16xf32>
    %131 = vector.multi_reduction <add>, %130, %cst_49 [1] : vector<16x32xf32> to vector<16xf32>
    %132 = vector.shape_cast %131 : vector<16xf32> to vector<16x1xf32>
    %cst_50 = arith.constant 3.200000e+01 : f32
    %133 = vector.broadcast %cst_50 : f32 to vector<16x1xf32>
    %134 = arith.divf %132, %133 : vector<16x1xf32>
    %135 = vector.broadcast %127 : vector<16x1xf32> to vector<16x32xf32>
    %136 = arith.subf %121, %135 : vector<16x32xf32>
    %cst_51 = arith.constant 9.99999974E-6 : f32
    %137 = vector.broadcast %cst_51 : f32 to vector<16x1xf32>
    %138 = arith.addf %134, %137 : vector<16x1xf32>
    %139 = math.rsqrt %138 : vector<16x1xf32>
    %140 = vector.broadcast %139 : vector<16x1xf32> to vector<16x32xf32>
    %141 = arith.mulf %136, %140 : vector<16x32xf32>
    %142 = vector.broadcast %122 : vector<1x32xf32> to vector<16x32xf32>
    %143 = arith.mulf %141, %142 : vector<16x32xf32>
    %144 = vector.broadcast %123 : vector<1x32xf32> to vector<16x32xf32>
    %145 = arith.addf %143, %144 : vector<16x32xf32>
    %cst_52 = arith.constant 0.000000e+00 : f32
    %146 = vector.broadcast %cst_52 : f32 to vector<16x32xf32>
    %c0_53 = arith.constant 0 : index
    %c0_54 = arith.constant 0 : index
    %147 = vector.load %arg10[%c0_53, %c0_54] : memref<32x128xf32, #tpu.memory_space<vmem>>, vector<32x128xf32>
    %cst_55 = arith.constant dense<0.000000e+00> : vector<16x128xf32>
    %148 = tpu.matmul %145, %147, %cst_55 {dimension_numbers = #tpu.dot_dimension_numbers<[1], [0], [0], [1], [0, 0, 1, 1], [], []>} : vector<16x32xf32>, vector<32x128xf32>, vector<16x128xf32> -> vector<16x128xf32>
    %c0_56 = arith.constant 0 : index
    %c0_57 = arith.constant 0 : index
    %149 = vector.load %arg11[%c0_56, %c0_57] : memref<1x128xf32, #tpu.memory_space<vmem>>, vector<1x128xf32>
    %150 = vector.broadcast %149 : vector<1x128xf32> to vector<16x128xf32>
    %151 = arith.addf %148, %150 : vector<16x128xf32>
    %cst_58 = arith.constant 1.702000e+00 : f32
    %152 = vector.broadcast %cst_58 : f32 to vector<16x128xf32>
    %153 = arith.mulf %152, %151 : vector<16x128xf32>
    %154 = arith.negf %153 : vector<16x128xf32>
    %155 = math.exp %154 : vector<16x128xf32>
    %cst_59 = arith.constant 1.000000e+00 : f32
    %156 = vector.broadcast %cst_59 : f32 to vector<16x128xf32>
    %157 = arith.addf %156, %155 : vector<16x128xf32>
    %158 = arith.divf %156, %157 : vector<16x128xf32>
    %159 = arith.mulf %151, %158 : vector<16x128xf32>
    %c0_60 = arith.constant 0 : index
    %c0_61 = arith.constant 0 : index
    %160 = vector.load %arg12[%c0_60, %c0_61] : memref<128x32xf32, #tpu.memory_space<vmem>>, vector<128x32xf32>
    %cst_62 = arith.constant dense<0.000000e+00> : vector<16x32xf32>
    %161 = tpu.matmul %159, %160, %cst_62 {dimension_numbers = #tpu.dot_dimension_numbers<[1], [0], [0], [1], [0, 0, 1, 1], [], []>} : vector<16x128xf32>, vector<128x32xf32>, vector<16x32xf32> -> vector<16x32xf32>
    %162 = arith.addf %146, %161 : vector<16x32xf32>
    %c0_63 = arith.constant 0 : index
    %c0_64 = arith.constant 0 : index
    %163 = vector.load %arg13[%c0_63, %c0_64] : memref<1x32xf32, #tpu.memory_space<vmem>>, vector<1x32xf32>
    %164 = vector.broadcast %163 : vector<1x32xf32> to vector<16x32xf32>
    %165 = arith.addf %162, %164 : vector<16x32xf32>
    %166 = arith.addf %121, %165 : vector<16x32xf32>
    %c0_65 = arith.constant 0 : index
    %c0_66 = arith.constant 0 : index
    %167 = vector.load %arg14[%c0_65, %c0_66] : memref<16x32xf32, #tpu.memory_space<vmem>>, vector<16x32xf32>
    tpu.vector_store %arg14[%c0_65, %c0_66], %166 {strides = array<i32>} : memref<16x32xf32, #tpu.memory_space<vmem>>, vector<16x32xf32>,
    return
  }
  func.func @transform_0(%arg0: i32) -> (i32, i32) {
    %c0_i32 = arith.constant 0 : i32
    %c0_i32_0 = arith.constant 0 : i32
    return %arg0, %c0_i32 : i32, i32
  }
  func.func @transform_1(%arg0: i32) -> (i32, i32) {
    %c0_i32 = arith.constant 0 : i32
    %c0_i32_0 = arith.constant 0 : i32
    %c0_i32_1 = arith.constant 0 : i32
    return %c0_i32, %c0_i32_0 : i32, i32
  }
  func.func @transform_2(%arg0: i32) -> (i32, i32) {
    %c0_i32 = arith.constant 0 : i32
    %c0_i32_0 = arith.constant 0 : i32
    %c0_i32_1 = arith.constant 0 : i32
    return %c0_i32, %c0_i32_0 : i32, i32
  }
  func.func @transform_3(%arg0: i32) -> (i32, i32) {
    %c0_i32 = arith.constant 0 : i32
    %c0_i32_0 = arith.constant 0 : i32
    %c0_i32_1 = arith.constant 0 : i32
    return %c0_i32, %c0_i32_0 : i32, i32
  }
  func.func @transform_4(%arg0: i32) -> (i32, i32) {
    %c0_i32 = arith.constant 0 : i32
    %c0_i32_0 = arith.constant 0 : i32
    %c0_i32_1 = arith.constant 0 : i32
    return %c0_i32, %c0_i32_0 : i32, i32
  }
  func.func @transform_5(%arg0: i32) -> (i32, i32) {
    %c0_i32 = arith.constant 0 : i32
    %c0_i32_0 = arith.constant 0 : i32
    %c0_i32_1 = arith.constant 0 : i32
    return %c0_i32, %c0_i32_0 : i32, i32
  }
  func.func @transform_6(%arg0: i32) -> (i32, i32) {
    %c0_i32 = arith.constant 0 : i32
    %c0_i32_0 = arith.constant 0 : i32
    %c0_i32_1 = arith.constant 0 : i32
    return %c0_i32, %c0_i32_0 : i32, i32
  }
  func.func @transform_7(%arg0: i32) -> (i32, i32) {
    %c0_i32 = arith.constant 0 : i32
    %c0_i32_0 = arith.constant 0 : i32
    %c0_i32_1 = arith.constant 0 : i32
    return %c0_i32, %c0_i32_0 : i32, i32
  }
  func.func @transform_8(%arg0: i32) -> (i32, i32) {
    %c0_i32 = arith.constant 0 : i32
    %c0_i32_0 = arith.constant 0 : i32
    %c0_i32_1 = arith.constant 0 : i32
    return %c0_i32, %c0_i32_0 : i32, i32
  }
  func.func @transform_9(%arg0: i32) -> (i32, i32) {
    %c0_i32 = arith.constant 0 : i32
    %c0_i32_0 = arith.constant 0 : i32
    %c0_i32_1 = arith.constant 0 : i32
    return %c0_i32, %c0_i32_0 : i32, i32
  }
  func.func @transform_10(%arg0: i32) -> (i32, i32) {
    %c0_i32 = arith.constant 0 : i32
    %c0_i32_0 = arith.constant 0 : i32
    %c0_i32_1 = arith.constant 0 : i32
    return %c0_i32, %c0_i32_0 : i32, i32
  }
  func.func @transform_11(%arg0: i32) -> (i32, i32) {
    %c0_i32 = arith.constant 0 : i32
    %c0_i32_0 = arith.constant 0 : i32
    %c0_i32_1 = arith.constant 0 : i32
    return %c0_i32, %c0_i32_0 : i32, i32
  }
  func.func @transform_12(%arg0: i32) -> (i32, i32) {
    %c0_i32 = arith.constant 0 : i32
    %c0_i32_0 = arith.constant 0 : i32
    %c0_i32_1 = arith.constant 0 : i32
    return %c0_i32, %c0_i32_0 : i32, i32
  }
  func.func @transform_13(%arg0: i32) -> (i32, i32) {
    %c0_i32 = arith.constant 0 : i32
    %c0_i32_0 = arith.constant 0 : i32
    return %arg0, %c0_i32 : i32, i32
  }
}

</mosaic_0001>

<bundles_post_ra>
// kernel: tpu_custom_call.1
= control target key start
LH: loop header
LB: loop body
LE: loop exit
PB: predicated region body
PF: predicated region fallthrough
CT: control target
= control target key end

     0   :  { %s2781_s25 = smov 0   ;;  %s3083_s0 = inlined_call_operand.vmem [shape: f32[64,32], index: 0, kind: input, shape index: {}]   ;;  %s3084_s1 = inlined_call_operand.vmem [shape: f32[1,32], index: 1, kind: input, shape index: {}]   ;;  %s3085_s2 = inlined_call_operand.vmem [shape: f32[1,32], index: 2, kind: input, shape index: {}]   ;;  %s3086_s3 = inlined_call_operand.vmem [shape: f32[32,96], index: 3, kind: input, shape index: {}]   ;;  %s3087_s4 = inlined_call_operand.vmem [shape: f32[1,96], index: 4, kind: input, shape index: {}]   ;;  %s3088_s5 = inlined_call_operand.vmem [shape: f32[32,32], index: 5, kind: input, shape index: {}]   ;;  %s3089_s6 = inlined_call_operand.vmem [shape: f32[1,32], index: 6, kind: input, shape index: {}]   ;;  %s3090_s7 = inlined_call_operand.vmem [shape: f32[1,32], index: 7, kind: input, shape index: {}]   ;;  %s3091_s8 = inlined_call_operand.vmem [shape: f32[1,32], index: 8, kind: input, shape index: {}]   ;;  %s3092_s9 = inlined_call_operand.vmem [shape: f32[32,128], index: 9, kind: input, shape index: {}]   ;;  %s3093_s10 = inlined_call_operand.vmem [shape: f32[1,128], index: 10, kind: input, shape index: {}]   ;;  %s3094_s11 = inlined_call_operand.vmem [shape: f32[128,32], index: 11, kind: input, shape index: {}]   ;;  %s3095_s12 = inlined_call_operand.vmem [shape: f32[1,32], index: 12, kind: input, shape index: {}]   ;;  %s3096_s13 = inlined_call_operand.vmem [shape: f32[64,32], index: 13, kind: output, shape index: {}]  }
   0x1 LB: > { %s2348_s26 = sadd.s32 4294967295, %s2693_s25   ;;  %p2352_p0 = scmp.ge.s32.totalorder %s2693_s25, 1  ;;  %s2693_s25 = sphi %s2781_s25, %s23_s25  }
   0x2   : > { %p388_p1 = scmp.lt.s32.totalorder %s2693_s25, 5 }
   0x4   : > { %p389_p2 = pnand %p2352_p0, %p388_p1 }
   0x5   : > { %s2353_s27 = sshll.u32 (!%p389_p2), %s2348_s26, 1  ;;  %s2697_s15 = smov (!%p389_p2), 96  }
   0x6   : > { %392 = sbr.rel (%p389_p2) target bundleno = 3939 (0xf63), region = 72  ;;  %p433_p3 = scmp.lt.s32.totalorder (!%p389_p2), %s2353_s27, 7 }
   0x7   : > { %s2698_s16 = smov (!%p389_p2), 64   ;;  %s2699_s17 = smov (!%p389_p2), 88  }
   0x8   : > { %s2700_s18 = smov (!%p389_p2), 120   ;;  %s2701_s19 = smov (!%p389_p2), 56  }
   0x9   : > { %s2702_s20 = smov (!%p389_p2), 80   ;;  %s2703_s21 = smov (!%p389_p2), 112  }
   0xa   : > { %s2704_s22 = smov (!%p389_p2), 48   ;;  %s2705_s23 = smov (!%p389_p2), 72  }
   0xb   : > { %s3098_s27 = smov (!%p433_p3, %s2353_s27), 7  ;;  %vm448_vm0 = vcmask 261120   ;;  %v495_v14 = vld [vmem:[%s3086_s3 + $0x18] sm:$0xff]  ;;  %v494_v15 = vld [vmem:[%s3086_s3 + $0x10] sm:$0xff]  ;;  %v493_v16 = vld [vmem:[%s3086_s3 + $0x8] sm:$0xff]  ;;  %v2695_v34 = vmov 0.0  }
   0xc   : > { %s2354_s28 = sshll.u32 %s3098_s27, 3  ;;  %2467 = vmatprep.subr.mxu1 %v495_v14  ;;  %v492_v17 = vld [vmem:[%s3086_s3] sm:$0xff]  ;;  %2488 = vmatprep.subr.mxu0 %v2695_v34  ;;  %vm2696_vm1 = vmmov 0   ;;  %vm589_vm2 = vcmask 64512   ;;  %s2706_s24 = smov 104   ;;  %vm1257_vm3 = vcmask 130112  }
   0xd   : > { %s436_s14 = scalar_lea.vmem %s3083_s0, %s2354_s28  ;;  %2468 = vmatpush3.msra.mxu1 %v495_v14  ;;  %v2357_v25 = vld [vmem:[%s3084_s1] ss:$0 sm:$0xff]  ;;  %2490 = vmatprep.mubr.msk.f32.mxu0 %vm2696_vm1, %v2695_v34  ;;  %s2707_s26 = smov 40   ;;  %vm1598_vm4 = vcmask 195712   ;;  %vm1939_vm5 = vcmask 261312  }
   0xe   : > { %v2797_v0 = vld [vmem:[%s436_s14] sm:$0xff]  ;;  %v2799_v1 = vld [vmem:[%s436_s14 + $0x8] sm:$0xff]  ;;  %2469 = vmatprep.subr.mxu1 %v494_v15  ;;  %s2708_s29 = smov 8   ;;  %s2709_s30 = smov 16  }
   0xf   : > { %v449_v2 = vsel %vm448_vm0, %v2797_v0, 0.0  ;;  %v452_v3 = vsel %vm448_vm0, %v2799_v1, 0.0  ;;  %2470 = vmatpush3.msra.mxu1 %v494_v15  ;;  %v2358_v27 = vld [vmem:[%s3085_s2] ss:$0 sm:$0xff] }
  0x10   : > { %450 = vadd.xlane.f32.xlu0 %v449_v2  ;;  %2471 = vmatprep.subr.mxu1 %v493_v16  ;;  %v2359_v35 = vld [vmem:[%s3087_s4] ss:$0 sm:$0xff] }
  0x11   : > { %2472 = vmatpush3.msra.mxu1 %v493_v16 }
  0x12   : > { %2473 = vmatprep.subr.mxu1 %v492_v17 }
  0x13   : > { %2474 = vmatpush3.msra.mxu1 %v492_v17 }
  0x14   : > { %453 = vadd.xlane.f32.xlu0 %v452_v3  ;;  %2478 = vmatprep.subr.mxu1 %v2695_v34 }
  0x99   : > { %v451_v4 = vpop.xlane.xlu0 %450 }
  0x9a   : > { %v456_v5 = vmul.f32 0.03125, %v451_v4 }
  0x9c   : > { %v458_v6 = vsub.f32 %v2797_v0, %v456_v5 }
  0x9d   : > { %v454_v7 = vpop.xlane.xlu0 %453 }
  0x9e   : > { %v457_v8 = vmul.f32 0.03125, %v454_v7  ;;  %v460_v9 = vmul.f32 %v458_v6, %v458_v6 }
  0xa0   : > { %v459_v10 = vsub.f32 %v2799_v1, %v457_v8  ;;  %v462_v11 = vsel %vm448_vm0, %v460_v9, 0.0 }
  0xa1   : > { %463 = vadd.xlane.f32.xlu1 %v462_v11 }
  0xa2   : > { %v461_v12 = vmul.f32 %v459_v10, %v459_v10 }
  0xa4   : > { %v465_v13 = vsel %vm448_vm0, %v461_v12, 0.0 }
  0xa5   : > { %466 = vadd.xlane.f32.xlu1 %v465_v13 }
 0x12a   : > { %v464_v18 = vpop.xlane.xlu1 %463 }
 0x12b   : > { %v468_v19 = vmul.f32 0.03125, %v464_v18 }
 0x12d   : > { %v470_v20 = vadd.f32 1e-05, %v468_v19 }
 0x12e   : > { %v467_v21 = vpop.xlane.xlu1 %466 }
 0x12f   : > { %2639 = vrsqrt.f32 %v470_v20  ;;  %v469_v22 = vmul.f32 0.03125, %v467_v21 }
 0x131   : > { %v471_v23 = vadd.f32 1e-05, %v469_v22 }
 0x133   : > { %2641 = vrsqrt.f32 %v471_v23 }
 0x13c   : > { %v2640_v24 = vpop.eup %2639 }
 0x13d   : > { %v474_v26 = vmul.f32 %v2640_v24, %v458_v6 }
 0x13f   : > { %v482_v28 = vmul.f32 %v2357_v25, %v474_v26 }
 0x140   : > { %v2642_v29 = vpop.eup %2641 }
 0x141   : > { %v475_v30 = vmul.f32 %v2642_v29, %v459_v10  ;;  %v490_v31 = vadd.f32 %v2358_v27, %v482_v28 }
 0x143   : > { %v483_v32 = vmul.f32 %v2357_v25, %v475_v30  ;;  %2475 = vmatprep.mubr.msk.f32.mxu1 %vm448_vm0, %v490_v31 }
 0x145   : > { %v491_v33 = vadd.f32 %v2358_v27, %v483_v32 }
 0x147   : > { %2476 = vmatmul.mubr.msk.f32.vlgmr.msra.gmra.mxu1 %vm448_vm0, %v491_v33 }
 0x148   : > { %2480 = vmatprep.mubr.msk.f32.mxu1 %vm2696_vm1, %v2695_v34 }
 0x207   : > { %v2477_v36 = vpop.f32.mrf.mxu1 }
 0x208   : > { %v2838_v37 = vadd.f32 %v2477_v36, %v2359_v35 }
 0x209   : > { %v575_v38 = vpop.f32.mrf.mxu1 }
 0x20a   : > { %v2840_v39 = vadd.f32 %v2359_v35, %v575_v38  ;;  %666 = vrot.lane.b32.xlu1 %v2838_v37, %s2697_s15  ;;  %v2855_v43 = vmul.f32 0.35355338, %v2838_v37 }
 0x20c   : > { %587 = vrot.lane.b32.xlu0 %v2840_v39, %s2697_s15  ;;  %v2846_v41 = vmul.f32 0.35355338, %v2840_v39 }
 0x27c   : > { %v667_v42 = vpop.permute.xlu1 %666 }
 0x27e   : > { %v588_v40 = vpop.permute.xlu0 %587 }
 0x27f   : > { %2479 = vmatpush3.xpose.msk.msra.mxu1 %vm589_vm2, %v588_v40 }
 0x280   : > { %2483 = vmatprep.subr.mxu1 %v2695_v34 }
 0x282   : > { %2481 = vmatmul.mubr.msk.f32.vlgmr.msra.gmra.mxu1 %vm589_vm2, %v2846_v41 }
 0x283   : > { %2484 = vmatpush3.xpose.msk.msra.mxu1 %vm589_vm2, %v667_v42  ;;  %2485 = vmatprep.mubr.msk.f32.mxu1 %vm2696_vm1, %v2695_v34 }
 0x284   : > { %2493 = vmatprep.subr.mxu1 %v2695_v34 }
 0x286   : > { %2486 = vmatmul.mubr.msk.f32.vlgmr.msra.gmra.mxu1 %vm589_vm2, %v2855_v43 }
 0x287   : > { %2495 = vmatprep.mubr.msk.f32.mxu1 %vm2696_vm1, %v2695_v34 }
 0x342   : > { %v661_v44 = vpop.f32.mrf.mxu1 }
 0x343   : > { %v743_v45 = vsel %vm589_vm2, %v661_v44, -inf }
 0x344   : > { %744 = vmax.xlane.f32.xlu1 %v743_v45  ;;  %v2482_v46 = vpop.f32.mrf.mxu1 }
 0x346   : > { %v739_v47 = vpop.f32.mrf.mxu1 }
 0x347   : > { %v746_v48 = vsel %vm589_vm2, %v739_v47, -inf }
 0x348   : > { %747 = vmax.xlane.f32.xlu0 %v746_v48  ;;  %v2487_v49 = vpop.f32.mrf.mxu1 }
 0x355   : > { %841 = vrot.lane.b32.xlu1 %v2838_v37, %s2698_s16 }
 0x359   : > { %921 = vrot.lane.b32.xlu1 %v2840_v39, %s2699_s17 }
 0x35d   : > { %999 = vrot.lane.b32.xlu1 %v2838_v37, %s2699_s17 }
 0x3cd   : > { %v745_v50 = vpop.xlane.xlu1 %744 }
 0x3ce   : > { %v749_v51 = vsub.f32 %v661_v44, %v745_v50 }
 0x3d0   : > { %v751_v52 = vmul.f32 1.442695, %v749_v51 }
 0x3d1   : > { %v842_v53 = vpop.permute.xlu1 %841  ;;  %v748_v54 = vpop.xlane.xlu0 %747 }
 0x3d2   : > { %2643 = vpow2.f32 %v751_v52  ;;  %v750_v55 = vsub.f32 %v739_v47, %v748_v54  ;;  %2494 = vmatpush3.msra.mxu1 %v842_v53 }
 0x3d3   : > { %2503 = vmatprep.subr.mxu1 %v2695_v34 }
 0x3d4   : > { %v753_v56 = vmul.f32 1.442695, %v750_v55 }
 0x3d5   : > { %v922_v61 = vpop.permute.xlu1 %921 }
 0x3d6   : > { %2645 = vpow2.f32 %v753_v56 }
 0x3d9   : > { %v1000_v62 = vpop.permute.xlu1 %999 }
 0x3df   : > { %v2644_v57 = vpop.eup %2643 }
 0x3e0   : > { %v755_v58 = vsel %vm589_vm2, %v2644_v57, 0.0 }
 0x3e1   : > { %756 = vadd.xlane.f32.xlu0 %v755_v58 }
 0x3e3   : > { %v2646_v59 = vpop.eup %2645 }
 0x3e4   : > { %v758_v60 = vsel %vm589_vm2, %v2646_v59, 0.0 }
 0x3e5   : > { %759 = vadd.xlane.f32.xlu1 %v758_v60 }
 0x3f6   : > { %997 = vrot.lane.b32.xlu1 %v2855_v43, %s2700_s18 }
 0x3f7   : > { %765 = vrot.lane.b32.xlu0 %v2840_v39, %s2698_s16 }
 0x3fb   : > { %919 = vrot.lane.b32.xlu0 %v2846_v41, %s2700_s18 }
 0x46a   : > { %v757_v63 = vpop.xlane.xlu0 %756 }
 0x46b   : > { %2647 = vrcp.f32 %v757_v63 }
 0x46e   : > { %v760_v2 = vpop.xlane.xlu1 %759  ;;  %v766_v3 = vpop.permute.xlu0 %765 }
 0x46f   : > { %2649 = vrcp.f32 %v760_v2  ;;  %2489 = vmatpush3.msra.mxu0 %v766_v3 }
 0x470   : > { %2498 = vmatprep.subr.mxu0 %v2695_v34 }
 0x472   : > { %v920_v8 = vpop.permute.xlu0 %919  ;;  %v998_v9 = vpop.permute.xlu1 %997 }
 0x478   : > { %v2648_v4 = vpop.eup %2647 }
 0x479   : > { %v763_v5 = vmul.f32 %v2648_v4, %v2644_v57 }
 0x47b   : > { %2491 = vmatmul.mubr.msk.f32.vlgmr.msra.gmra.mxu0 %vm589_vm2, %v763_v5 }
 0x47c   : > { %v2650_v6 = vpop.eup %2649  ;;  %2499 = vmatpush3.xpose.msk.msra.mxu0 %vm589_vm2, %v922_v61  ;;  %2500 = vmatprep.mubr.msk.f32.mxu0 %vm2696_vm1, %v2695_v34 }
 0x47d   : > { %v764_v7 = vmul.f32 %v2650_v6, %v2646_v59  ;;  %2508 = vmatprep.subr.mxu0 %v2695_v34 }
 0x47f   : > { %2496 = vmatmul.mubr.msk.f32.vlgmr.msra.gmra.mxu1 %vm589_vm2, %v764_v7  ;;  %2501 = vmatmul.mubr.msk.f32.vlgmr.msra.gmra.mxu0 %vm589_vm2, %v920_v8 }
 0x480   : > { %2504 = vmatpush3.xpose.msk.msra.mxu1 %vm589_vm2, %v1000_v62  ;;  %2505 = vmatprep.mubr.msk.f32.mxu1 %vm2696_vm1, %v2695_v34 }
 0x481   : > { %2513 = vmatprep.subr.mxu1 %v2695_v34  ;;  %2510 = vmatprep.mubr.msk.f32.mxu0 %vm2696_vm1, %v2695_v34 }
 0x483   : > { %2506 = vmatmul.mubr.msk.f32.vlgmr.msra.gmra.mxu1 %vm589_vm2, %v998_v9 }
 0x484   : > { %2515 = vmatprep.mubr.msk.f32.mxu1 %vm2696_vm1, %v2695_v34 }
 0x53b   : > { %v837_v10 = vpop.f32.mrf.mxu0 }
 0x53c   : > { %917 = vst.msk [vmem:[#allocation2] sm:$0xff] %vm589_vm2, %v837_v10 }
 0x53d   : > { %v2492_v11 = vpop.f32.mrf.mxu0 }
 0x53f   : > { %v913_v12 = vpop.f32.mrf.mxu1  ;;  %v993_v13 = vpop.f32.mrf.mxu0 }
 0x540   : > { %918 = vst.msk [vmem:[#allocation2 + $0x8] sm:$0xff] %vm589_vm2, %v913_v12  ;;  %v1075_v14 = vsel %vm589_vm2, %v993_v13, -inf }
 0x541   : > { %1076 = vmax.xlane.f32.xlu0 %v1075_v14  ;;  %v2497_v15 = vpop.f32.mrf.mxu1  ;;  %v2502_v16 = vpop.f32.mrf.mxu0 }
 0x543   : > { %v1071_v17 = vpop.f32.mrf.mxu1 }
 0x544   : > { %v1078_v18 = vsel %vm589_vm2, %v1071_v17, -inf }
 0x545   : > { %1079 = vmax.xlane.f32.xlu1 %v1078_v18  ;;  %v2507_v19 = vpop.f32.mrf.mxu1 }
 0x556   : > { %1173 = vrot.lane.b32.xlu1 %v2838_v37, %s2701_s19 }
 0x557   : > { %1097 = vrot.lane.b32.xlu0 %v2840_v39, %s2701_s19  ;;  %s442_s19 = scalar_lea.vmem %s3096_s13, %s2354_s28 }
 0x55a   : > { %1262 = vrot.lane.b32.xlu1 %v2840_v39, %s2702_s20 }
 0x55e   : > { %1340 = vrot.lane.b32.xlu1 %v2838_v37, %s2702_s20 }
 0x562   : > { %1338 = vrot.lane.b32.xlu1 %v2855_v43, %s2703_s21 }
 0x5ca   : > { %v1077_v20 = vpop.xlane.xlu0 %1076 }
 0x5cb   : > { %v1081_v21 = vsub.f32 %v993_v13, %v1077_v20 }
 0x5cd   : > { %v1083_v22 = vmul.f32 1.442695, %v1081_v21 }
 0x5ce   : > { %v1098_v23 = vpop.permute.xlu0 %1097  ;;  %v1080_v24 = vpop.xlane.xlu1 %1079 }
 0x5cf   : > { %2651 = vpow2.f32 %v1083_v22  ;;  %v1082_v25 = vsub.f32 %v1071_v17, %v1080_v24  ;;  %2509 = vmatpush3.msra.mxu0 %v1098_v23 }
 0x5d0   : > { %2518 = vmatprep.subr.mxu0 %v2695_v34 }
 0x5d1   : > { %v1085_v26 = vmul.f32 1.442695, %v1082_v25 }
 0x5d2   : > { %v1174_v27 = vpop.permute.xlu1 %1173 }
 0x5d3   : > { %2653 = vpow2.f32 %v1085_v26  ;;  %2514 = vmatpush3.msra.mxu1 %v1174_v27 }
 0x5d4   : > { %2523 = vmatprep.subr.mxu1 %v2695_v34 }
 0x5d6   : > { %v1263_v35 = vpop.permute.xlu1 %1262 }
 0x5da   : > { %v1341_v42 = vpop.permute.xlu1 %1340 }
 0x5dc   : > { %v2652_v28 = vpop.eup %2651 }
 0x5dd   : > { %v1087_v29 = vsel %vm589_vm2, %v2652_v28, 0.0 }
 0x5de   : > { %1088 = vadd.xlane.f32.xlu0 %v1087_v29  ;;  %v1339_v46 = vpop.permute.xlu1 %1338 }
 0x5e0   : > { %v2654_v30 = vpop.eup %2653 }
 0x5e1   : > { %v1090_v31 = vsel %vm589_vm2, %v2654_v30, 0.0 }
 0x5e2   : > { %1091 = vadd.xlane.f32.xlu0 %v1090_v31 }
 0x5f8   : > { %1260 = vrot.lane.b32.xlu0 %v2846_v41, %s2703_s21 }
 0x667   : > { %v1089_v32 = vpop.xlane.xlu0 %1088 }
 0x668   : > { %2655 = vrcp.f32 %v1089_v32 }
 0x66b   : > { %v1092_v33 = vpop.xlane.xlu0 %1091 }
 0x66c   : > { %2657 = vrcp.f32 %v1092_v33 }
 0x66f   : > { %v1261_v45 = vpop.permute.xlu0 %1260 }
 0x675   : > { %v2656_v36 = vpop.eup %2655 }
 0x676   : > { %v1095_v38 = vmul.f32 %v2656_v36, %v2652_v28 }
 0x678   : > { %2511 = vmatmul.mubr.msk.f32.vlgmr.msra.gmra.mxu0 %vm589_vm2, %v1095_v38 }
 0x679   : > { %v2658_v40 = vpop.eup %2657  ;;  %2519 = vmatpush3.xpose.msk.msra.mxu0 %vm589_vm2, %v1263_v35  ;;  %2520 = vmatprep.mubr.msk.f32.mxu0 %vm2696_vm1, %v2695_v34 }
 0x67a   : > { %v1096_v44 = vmul.f32 %v2658_v40, %v2654_v30  ;;  %2528 = vmatprep.subr.mxu0 %v2695_v34 }
 0x67c   : > { %2516 = vmatmul.mubr.msk.f32.vlgmr.msra.gmra.mxu1 %vm589_vm2, %v1096_v44  ;;  %2521 = vmatmul.mubr.msk.f32.vlgmr.msra.gmra.mxu0 %vm589_vm2, %v1261_v45 }
 0x67d   : > { %2524 = vmatpush3.xpose.msk.msra.mxu1 %vm589_vm2, %v1341_v42  ;;  %2525 = vmatprep.mubr.msk.f32.mxu1 %vm2696_vm1, %v2695_v34 }
 0x67e   : > { %2533 = vmatprep.subr.mxu1 %v2695_v34  ;;  %2530 = vmatprep.mubr.msk.f32.mxu0 %vm2696_vm1, %v2695_v34 }
 0x680   : > { %2526 = vmatmul.mubr.msk.f32.vlgmr.msra.gmra.mxu1 %vm589_vm2, %v1339_v46 }
 0x681   : > { %2535 = vmatprep.mubr.msk.f32.mxu1 %vm2696_vm1, %v2695_v34 }
 0x738   : > { %v2920_v47 = vpop.f32.mrf.mxu0 }
 0x73a   : > { %v2512_v48 = vpop.f32.mrf.mxu0 }
 0x73c   : > { %v2922_v49 = vpop.f32.mrf.mxu1  ;;  %v1334_v50 = vpop.f32.mrf.mxu0 }
 0x73d   : > { %v1416_v51 = vsel %vm589_vm2, %v1334_v50, -inf }
 0x73e   : > { %1417 = vmax.xlane.f32.xlu0 %v1416_v51  ;;  %v2517_v52 = vpop.f32.mrf.mxu1  ;;  %v2522_v53 = vpop.f32.mrf.mxu0  ;;  %v1945_v51 = vld [vmem:[%s3088_s5 + $0x8] sm:$0xff] }
 0x73f   : > { %v1944_v52 = vld [vmem:[%s3088_s5] sm:$0xff] }
 0x740   : > { %v1412_v54 = vpop.f32.mrf.mxu1 }
 0x741   : > { %v1419_v55 = vsel %vm589_vm2, %v1412_v54, -inf }
 0x742   : > { %1420 = vmax.xlane.f32.xlu1 %v1419_v55  ;;  %v2527_v56 = vpop.f32.mrf.mxu1 }
 0x753   : > { %1514 = vrot.lane.b32.xlu1 %v2838_v37, %s2704_s22 }
 0x754   : > { %1438 = vrot.lane.b32.xlu0 %v2840_v39, %s2704_s22  ;;  %s2710_s22 = smov 24  }
 0x757   : > { %1603 = vrot.lane.b32.xlu1 %v2840_v39, %s2705_s23 }
 0x75b   : > { %1681 = vrot.lane.b32.xlu1 %v2838_v37, %s2705_s23 }
 0x75f   : > { %1679 = vrot.lane.b32.xlu1 %v2855_v43, %s2706_s24 }
 0x7c7   : > { %v1418_v57 = vpop.xlane.xlu0 %1417 }
 0x7c8   : > { %v1422_v58 = vsub.f32 %v1334_v50, %v1418_v57  ;;  %v1946_v50 = vld [vmem:[%s3088_s5 + $0x10] sm:$0xff] }
 0x7ca   : > { %v1424_v59 = vmul.f32 1.442695, %v1422_v58 }
 0x7cb   : > { %v1439_v60 = vpop.permute.xlu0 %1438  ;;  %v1421_v61 = vpop.xlane.xlu1 %1420 }
 0x7cc   : > { %2659 = vpow2.f32 %v1424_v59  ;;  %v1423_v62 = vsub.f32 %v1412_v54, %v1421_v61  ;;  %2529 = vmatpush3.msra.mxu0 %v1439_v60  ;;  %v2386_v61 = vld [vmem:[%s3089_s6] ss:$0 sm:$0xff] }
 0x7cd   : > { %2538 = vmatprep.subr.mxu0 %v2695_v34 }
 0x7ce   : > { %v1426_v63 = vmul.f32 1.442695, %v1423_v62 }
 0x7cf   : > { %v1515_v2 = vpop.permute.xlu1 %1514 }
 0x7d0   : > { %2661 = vpow2.f32 %v1426_v63  ;;  %2534 = vmatpush3.msra.mxu1 %v1515_v2 }
 0x7d1   : > { %2543 = vmatprep.subr.mxu1 %v2695_v34 }
 0x7d3   : > { %v1604_v8 = vpop.permute.xlu1 %1603 }
 0x7d7   : > { %v1682_v12 = vpop.permute.xlu1 %1681 }
 0x7d9   : > { %v2660_v3 = vpop.eup %2659 }
 0x7da   : > { %v1428_v4 = vsel %vm589_vm2, %v2660_v3, 0.0 }
 0x7db   : > { %1429 = vadd.xlane.f32.xlu0 %v1428_v4  ;;  %v1680_v14 = vpop.permute.xlu1 %1679 }
 0x7dd   : > { %v2662_v43 = vpop.eup %2661 }
 0x7de   : > { %v1431_v5 = vsel %vm589_vm2, %v2662_v43, 0.0 }
 0x7df   : > { %1432 = vadd.xlane.f32.xlu0 %v1431_v5 }
 0x7f5   : > { %1601 = vrot.lane.b32.xlu0 %v2846_v41, %s2706_s24 }
 0x864   : > { %v1430_v6 = vpop.xlane.xlu0 %1429 }
 0x865   : > { %2663 = vrcp.f32 %v1430_v6 }
 0x868   : > { %v1433_v7 = vpop.xlane.xlu0 %1432 }
 0x869   : > { %2665 = vrcp.f32 %v1433_v7 }
 0x86c   : > { %v1602_v41 = vpop.permute.xlu0 %1601 }
 0x872   : > { %v2664_v9 = vpop.eup %2663 }
 0x873   : > { %v1436_v10 = vmul.f32 %v2664_v9, %v2660_v3 }
 0x875   : > { %2531 = vmatmul.mubr.msk.f32.vlgmr.msra.gmra.mxu0 %vm589_vm2, %v1436_v10 }
 0x876   : > { %v2666_v11 = vpop.eup %2665  ;;  %2539 = vmatpush3.xpose.msk.msra.mxu0 %vm589_vm2, %v1604_v8  ;;  %2540 = vmatprep.mubr.msk.f32.mxu0 %vm2696_vm1, %v2695_v34 }
 0x877   : > { %v1437_v13 = vmul.f32 %v2666_v11, %v2662_v43  ;;  %2548 = vmatprep.subr.mxu0 %v2695_v34 }
 0x879   : > { %2536 = vmatmul.mubr.msk.f32.vlgmr.msra.gmra.mxu1 %vm589_vm2, %v1437_v13  ;;  %2541 = vmatmul.mubr.msk.f32.vlgmr.msra.gmra.mxu0 %vm589_vm2, %v1602_v41 }
 0x87a   : > { %2544 = vmatpush3.xpose.msk.msra.mxu1 %vm589_vm2, %v1682_v12  ;;  %2545 = vmatprep.mubr.msk.f32.mxu1 %vm2696_vm1, %v2695_v34 }
 0x87b   : > { %2553 = vmatprep.subr.mxu1 %v2695_v34  ;;  %2550 = vmatprep.mubr.msk.f32.mxu0 %vm2696_vm1, %v2695_v34 }
 0x87d   : > { %2546 = vmatmul.mubr.msk.f32.vlgmr.msra.gmra.mxu1 %vm589_vm2, %v1680_v14  ;;  %v2085_v14 = vld [vmem:[%s3092_s9 + $0x18] sm:$0xff] }
 0x87e   : > { %2555 = vmatprep.mubr.msk.f32.mxu1 %vm2696_vm1, %v2695_v34 }
 0x935   : > { %v1510_v15 = vpop.f32.mrf.mxu0 }
 0x937   : > { %v2532_v16 = vpop.f32.mrf.mxu0 }
 0x938   : > { %v2083_v16 = vld [vmem:[%s3092_s9 + $0x8] sm:$0xff] }
 0x939   : > { %v1586_v17 = vpop.f32.mrf.mxu1  ;;  %v1675_v18 = vpop.f32.mrf.mxu0 }
 0x93a   : > { %v1757_v19 = vsel %vm589_vm2, %v1675_v18, -inf }
 0x93b   : > { %1758 = vmax.xlane.f32.xlu0 %v1757_v19  ;;  %v2537_v20 = vpop.f32.mrf.mxu1  ;;  %v2542_v21 = vpop.f32.mrf.mxu0 }
 0x93d   : > { %v1753_v22 = vpop.f32.mrf.mxu1 }
 0x93e   : > { %v1760_v23 = vsel %vm589_vm2, %v1753_v22, -inf }
 0x93f   : > { %1761 = vmax.xlane.f32.xlu1 %v1760_v23  ;;  %v2547_v24 = vpop.f32.mrf.mxu1 }
 0x950   : > { %1855 = vrot.lane.b32.xlu1 %v2838_v37, %s2707_s26 }
 0x954   : > { %1251 = vrot.lane.b32.xlu1 %v2920_v47, %s2708_s29 }
 0x958   : > { %1253 = vrot.lane.b32.xlu1 %v2922_v49, %s2708_s29 }
 0x95c   : > { %1594 = vrot.lane.b32.xlu1 %v1586_v17, %s2709_s30  ;;  %v2082_v17 = vld [vmem:[%s3092_s9] sm:$0xff] }
 0x9c4   : > { %v1759_v34 = vpop.xlane.xlu0 %1758 }
 0x9c5   : > { %v1763_v25 = vsub.f32 %v1675_v18, %v1759_v34  ;;  %v2389_v34 = vld [vmem:[%s3090_s7] ss:$0 sm:$0xff] }
 0x9c7   : > { %v1765_v26 = vmul.f32 1.442695, %v1763_v25 }
 0x9c8   : > { %v1762_v27 = vpop.xlane.xlu1 %1761 }
 0x9c9   : > { %2667 = vpow2.f32 %v1765_v26  ;;  %v1764_v28 = vsub.f32 %v1753_v22, %v1762_v27  ;;  %v2390_v26 = vld [vmem:[%s3091_s8] ss:$0 sm:$0xff] }
 0x9cb   : > { %v1767_v29 = vmul.f32 1.442695, %v1764_v28 }
 0x9cc   : > { %v1856_v30 = vpop.permute.xlu1 %1855 }
 0x9cd   : > { %2669 = vpow2.f32 %v1767_v29  ;;  %2554 = vmatpush3.msra.mxu1 %v1856_v30 }
 0x9d0   : > { %v1252_v31 = vpop.permute.xlu1 %1251 }
 0x9d1   : > { %1258 = vst.msk [vmem:[#allocation2] sm:$0xff] %vm1257_vm3, %v1252_v31 }
 0x9d4   : > { %v1254_v37 = vpop.permute.xlu1 %1253 }
 0x9d5   : > { %1259 = vst.msk [vmem:[#allocation2 + $0x8] sm:$0xff] %vm1257_vm3, %v1254_v37 }
 0x9d6   : > { %v2668_v32 = vpop.eup %2667 }
 0x9d7   : > { %v1769_v33 = vsel %vm589_vm2, %v2668_v32, 0.0 }
 0x9d8   : > { %1770 = vadd.xlane.f32.xlu0 %v1769_v33  ;;  %v1595_v35 = vpop.permute.xlu1 %1594  ;;  %v2204_v33 = vld [vmem:[%s3094_s11 + $0x70] sm:$0xff] }
 0x9d9   : > { %1600 = vst.msk [vmem:[#allocation2 + $0x8] sm:$0xff] %vm1598_vm4, %v1595_v35  ;;  %v2203_v35 = vld [vmem:[%s3094_s11 + $0x68] sm:$0xff] }
 0x9da   : > { %v2670_v36 = vpop.eup %2669 }
 0x9db   : > { %v1772_v38 = vsel %vm589_vm2, %v2670_v36, 0.0 }
 0x9dc   : > { %1773 = vadd.xlane.f32.xlu0 %v1772_v38  ;;  %v2201_v38 = vld [vmem:[%s3094_s11 + $0x58] sm:$0xff] }
 0x9f2   : > { %1779 = vrot.lane.b32.xlu0 %v2840_v39, %s2707_s26  ;;  %v1947_v39 = vld [vmem:[%s3088_s5 + $0x18] sm:$0xff] }
 0x9f3   : > { %2558 = vmatprep.subr.mxu1 %v1947_v39 }
 0x9f6   : > { %1592 = vrot.lane.b32.xlu0 %v1510_v15, %s2709_s30  ;;  %v2084_v15 = vld [vmem:[%s3092_s9 + $0x10] sm:$0xff] }
 0xa61   : > { %v1771_v40 = vpop.xlane.xlu0 %1770 }
 0xa62   : > { %2671 = vrcp.f32 %v1771_v40  ;;  %v2200_v40 = vld [vmem:[%s3094_s11 + $0x50] sm:$0xff] }
 0xa65   : > { %v1774_v42 = vpop.xlane.xlu0 %1773 }
 0xa66   : > { %2673 = vrcp.f32 %v1774_v42  ;;  %v2199_v42 = vld [vmem:[%s3094_s11 + $0x48] sm:$0xff] }
 0xa69   : > { %v1780_v44 = vpop.permute.xlu0 %1779 }
 0xa6a   : > { %2549 = vmatpush3.msra.mxu0 %v1780_v44  ;;  %v2198_v44 = vld [vmem:[%s3094_s11 + $0x40] sm:$0xff] }
 0xa6d   : > { %v1593_v45 = vpop.permute.xlu0 %1592 }
 0xa6e   : > { %1599 = vst.msk [vmem:[#allocation2] sm:$0xff] %vm1598_vm4, %v1593_v45  ;;  %v2197_v45 = vld [vmem:[%s3094_s11 + $0x38] sm:$0xff] }
 0xa6f   : > { %v2672_v46 = vpop.eup %2671 }
 0xa70   : > { %v1777_v47 = vmul.f32 %v2672_v46, %v2668_v32  ;;  %v2205_v32 = vld [vmem:[%s3094_s11 + $0x78] sm:$0xff]  ;;  %v2196_v46 = vld [vmem:[%s3094_s11 + $0x30] sm:$0xff] }
 0xa71   : > { %2580 = vmatprep.subr.mxu0 %v2205_v32 }
 0xa72   : > { %2551 = vmatmul.mubr.msk.f32.vlgmr.msra.gmra.mxu0 %vm589_vm2, %v1777_v47  ;;  %v2195_v47 = vld [vmem:[%s3094_s11 + $0x28] sm:$0xff] }
 0xa73   : > { %v2674_v48 = vpop.eup %2673  ;;  %2581 = vmatpush3.msra.mxu0 %v2205_v32 }
 0xa74   : > { %v1778_v49 = vmul.f32 %v2674_v48, %v2670_v36  ;;  %2582 = vmatprep.subr.mxu0 %v2204_v33  ;;  %v2202_v36 = vld [vmem:[%s3094_s11 + $0x60] sm:$0xff] }
 0xa75   : > { %2583 = vmatpush3.msra.mxu0 %v2204_v33  ;;  %v2194_v48 = vld [vmem:[%s3094_s11 + $0x20] sm:$0xff] }
 0xa76   : > { %2556 = vmatmul.mubr.msk.f32.vlgmr.msra.gmra.mxu1 %vm589_vm2, %v1778_v49  ;;  %2584 = vmatprep.subr.mxu0 %v2203_v35  ;;  %v2193_v49 = vld [vmem:[%s3094_s11 + $0x18] sm:$0xff] }
 0xa77   : > { %2559 = vmatpush3.msra.mxu1 %v1947_v39  ;;  %2585 = vmatpush3.msra.mxu0 %v2203_v35  ;;  %v2192_v39 = vld [vmem:[%s3094_s11 + $0x10] sm:$0xff] }
 0xa78   : > { %2560 = vmatprep.subr.mxu1 %v1946_v50  ;;  %2586 = vmatprep.subr.mxu0 %v2202_v36 }
 0xa79   : > { %2561 = vmatpush3.msra.mxu1 %v1946_v50  ;;  %2587 = vmatpush3.msra.mxu0 %v2202_v36  ;;  %v2191_v50 = vld [vmem:[%s3094_s11 + $0x8] sm:$0xff] }
 0xa7a   : > { %2562 = vmatprep.subr.mxu1 %v1945_v51  ;;  %2588 = vmatprep.subr.mxu0 %v2201_v38 }
 0xa7b   : > { %2563 = vmatpush3.msra.mxu1 %v1945_v51  ;;  %2589 = vmatpush3.msra.mxu0 %v2201_v38  ;;  %v2190_v51 = vld [vmem:[%s3094_s11] sm:$0xff] }
 0xa7c   : > { %2564 = vmatprep.subr.mxu1 %v1944_v52  ;;  %2590 = vmatprep.subr.mxu0 %v2200_v40 }
 0xa7d   : > { %2565 = vmatpush3.msra.mxu1 %v1944_v52  ;;  %2591 = vmatpush3.msra.mxu0 %v2200_v40  ;;  %v2391_v52 = vld [vmem:[%s3093_s10] ss:$0 sm:$0xff] }
 0xa7e   : > { %2569 = vmatprep.subr.mxu1 %v2085_v14  ;;  %2592 = vmatprep.subr.mxu0 %v2199_v42 }
 0xa7f   : > { %2593 = vmatpush3.msra.mxu0 %v2199_v42 }
 0xa80   : > { %2594 = vmatprep.subr.mxu0 %v2198_v44 }
 0xa81   : > { %2595 = vmatpush3.msra.mxu0 %v2198_v44 }
 0xa82   : > { %2596 = vmatprep.subr.mxu0 %v2197_v45 }
 0xa83   : > { %2597 = vmatpush3.msra.mxu0 %v2197_v45 }
 0xa84   : > { %2598 = vmatprep.subr.mxu0 %v2196_v46 }
 0xa85   : > { %2599 = vmatpush3.msra.mxu0 %v2196_v46 }
 0xa86   : > { %2600 = vmatprep.subr.mxu0 %v2195_v47 }
 0xa87   : > { %2601 = vmatpush3.msra.mxu0 %v2195_v47 }
 0xa88   : > { %2602 = vmatprep.subr.mxu0 %v2194_v48 }
 0xa89   : > { %2603 = vmatpush3.msra.mxu0 %v2194_v48 }
 0xa8a   : > { %2604 = vmatprep.subr.mxu0 %v2193_v49 }
 0xa8b   : > { %2605 = vmatpush3.msra.mxu0 %v2193_v49 }
 0xa8c   : > { %2606 = vmatprep.subr.mxu0 %v2192_v39 }
 0xa8d   : > { %2607 = vmatpush3.msra.mxu0 %v2192_v39 }
 0xa8e   : > { %2608 = vmatprep.subr.mxu0 %v2191_v50 }
 0xa8f   : > { %2609 = vmatpush3.msra.mxu0 %v2191_v50 }
 0xa90   : > { %2610 = vmatprep.subr.mxu0 %v2190_v51 }
 0xa91   : > { %2611 = vmatpush3.msra.mxu0 %v2190_v51 }
 0xb32   : > { %v1851_v53 = vpop.f32.mrf.mxu0 }
 0xb33   : > { %1933 = vrot.lane.b32.xlu0 %v1851_v53, %s2710_s22 }
 0xb34   : > { %v2552_v54 = vpop.f32.mrf.mxu0 }
 0xb36   : > { %v1927_v55 = vpop.f32.mrf.mxu1 }
 0xb37   : > { %1935 = vrot.lane.b32.xlu1 %v1927_v55, %s2710_s22 }
 0xb38   : > { %v2557_v56 = vpop.f32.mrf.mxu1 }
 0xba5   : > { %v1934_v57 = vpop.permute.xlu0 %1933 }
 0xba6   : > { %1940 = vst.msk [vmem:[#allocation2] sm:$0xff] %vm1939_vm5, %v1934_v57 }
 0xba9   : > { %v1936_v58 = vpop.permute.xlu1 %1935 }
 0xbaa   : > { %1941 = vst.msk [vmem:[#allocation2 + $0x8] sm:$0xff] %vm1939_vm5, %v1936_v58 }
 0xbad   : > { %v1942_v59 = vld [vmem:[#allocation2] sm:$0xff] }
 0xbae   : > { %2566 = vmatprep.mubr.msk.f32.mxu1 %vm448_vm0, %v1942_v59 }
 0xbb1   : > { %v1943_v60 = vld [vmem:[#allocation2 + $0x8] sm:$0xff] }
 0xbb2   : > { %2567 = vmatmul.mubr.msk.f32.vlgmr.msra.gmra.mxu1 %vm448_vm0, %v1943_v60 }
 0xbb3   : > { %2570 = vmatpush3.msra.mxu1 %v2085_v14 }
 0xbb4   : > { %2571 = vmatprep.subr.mxu1 %v2084_v15 }
 0xbb5   : > { %2572 = vmatpush3.msra.mxu1 %v2084_v15 }
 0xbb6   : > { %2573 = vmatprep.subr.mxu1 %v2083_v16 }
 0xbb7   : > { %2574 = vmatpush3.msra.mxu1 %v2083_v16 }
 0xbb8   : > { %2575 = vmatprep.subr.mxu1 %v2082_v17 }
 0xbb9   : > { %2576 = vmatpush3.msra.mxu1 %v2082_v17 }
 0xc72   : > { %v2568_v62 = vpop.f32.mrf.mxu1 }
 0xc73   : > { %v2033_v63 = vadd.f32 %v2568_v62, %v2386_v61 }
 0xc74   : > { %v2027_v2 = vpop.f32.mrf.mxu1 }
 0xc75   : > { %v2984_v3 = vadd.f32 %v2033_v63, %v2799_v1  ;;  %v2028_v4 = vadd.f32 %v2386_v61, %v2027_v2 }
 0xc77   : > { %v2987_v43 = vadd.f32 %v2028_v4, %v2797_v0  ;;  %v2043_v5 = vsel %vm448_vm0, %v2984_v3, 0.0 }
 0xc78   : > { %2044 = vadd.xlane.f32.xlu1 %v2043_v5 }
 0xc79   : > { %v2040_v6 = vsel %vm448_vm0, %v2987_v43, 0.0 }
 0xc7a   : > { %2041 = vadd.xlane.f32.xlu0 %v2040_v6 }
 0xd01   : > { %v2045_v7 = vpop.xlane.xlu1 %2044 }
 0xd02   : > { %v2047_v8 = vmul.f32 0.03125, %v2045_v7 }
 0xd03   : > { %v2042_v9 = vpop.xlane.xlu0 %2041 }
 0xd04   : > { %v2046_v10 = vmul.f32 0.03125, %v2042_v9  ;;  %v2049_v11 = vsub.f32 %v2984_v3, %v2047_v8  ;;  %v2396_v8 = vld [vmem:[%s3095_s12] ss:$0 sm:$0xff] }
 0xd06   : > { %v2048_v1 = vsub.f32 %v2987_v43, %v2046_v10  ;;  %v2051_v13 = vmul.f32 %v2049_v11, %v2049_v11 }
 0xd08   : > { %v2050_v12 = vmul.f32 %v2048_v1, %v2048_v1  ;;  %v2055_v41 = vsel %vm448_vm0, %v2051_v13, 0.0 }
 0xd0a   : > { %v2052_v0 = vsel %vm448_vm0, %v2050_v12, 0.0 }
 0xd0b   : > { %2053 = vadd.xlane.f32.xlu0 %v2052_v0 }
 0xd0f   : > { %2056 = vadd.xlane.f32.xlu0 %v2055_v41 }
 0xd94   : > { %v2054_v18 = vpop.xlane.xlu0 %2053 }
 0xd95   : > { %v2058_v19 = vmul.f32 0.03125, %v2054_v18 }
 0xd97   : > { %v2060_v20 = vadd.f32 1e-05, %v2058_v19 }
 0xd98   : > { %v2057_v21 = vpop.xlane.xlu0 %2056 }
 0xd99   : > { %2675 = vrsqrt.f32 %v2060_v20  ;;  %v2059_v22 = vmul.f32 0.03125, %v2057_v21 }
 0xd9b   : > { %v2061_v23 = vadd.f32 1e-05, %v2059_v22 }
 0xd9d   : > { %2677 = vrsqrt.f32 %v2061_v23 }
 0xda6   : > { %v2676_v24 = vpop.eup %2675 }
 0xda7   : > { %v2064_v25 = vmul.f32 %v2676_v24, %v2048_v1 }
 0xda9   : > { %v2072_v27 = vmul.f32 %v2389_v34, %v2064_v25 }
 0xdaa   : > { %v2678_v28 = vpop.eup %2677 }
 0xdab   : > { %v2065_v29 = vmul.f32 %v2678_v28, %v2049_v11  ;;  %v2080_v30 = vadd.f32 %v2390_v26, %v2072_v27 }
 0xdad   : > { %v2073_v31 = vmul.f32 %v2389_v34, %v2065_v29  ;;  %2577 = vmatprep.mubr.msk.f32.mxu1 %vm448_vm0, %v2080_v30 }
 0xdaf   : > { %v2081_v37 = vadd.f32 %v2390_v26, %v2073_v31 }
 0xdb1   : > { %2578 = vmatmul.mubr.msk.f32.vlgmr.msra.gmra.mxu1 %vm448_vm0, %v2081_v37 }
 0xe71   : > { %v2579_v53 = vpop.f32.mrf.mxu1 }
 0xe72   : > { %v2171_v54 = vadd.f32 %v2579_v53, %v2391_v52 }
 0xe73   : > { %v2165_v55 = vpop.f32.mrf.mxu1 }
 0xe74   : > { %v2395_v56 = vmul.f32 -1.702, %v2171_v54  ;;  %v2166_v57 = vadd.f32 %v2391_v52, %v2165_v55 }
 0xe76   : > { %v2180_v58 = vmul.f32 1.442695, %v2395_v56  ;;  %v2394_v59 = vmul.f32 -1.702, %v2166_v57 }
 0xe78   : > { %2679 = vpow2.f32 %v2180_v58  ;;  %v2178_v60 = vmul.f32 1.442695, %v2394_v59 }
 0xe7a   : > { %2681 = vpow2.f32 %v2178_v60 }
 0xe85   : > { %v2680_v61 = vpop.eup %2679 }
 0xe86   : > { %v2183_v62 = vadd.f32 1.0, %v2680_v61 }
 0xe87   : > { %v2682_v63 = vpop.eup %2681 }
 0xe88   : > { %v2182_v2 = vadd.f32 1.0, %v2682_v63  ;;  %2683 = vrcp.f32 %v2183_v62 }
 0xe8a   : > { %2685 = vrcp.f32 %v2182_v2 }
 0xe95   : > { %v2684_v4 = vpop.eup %2683 }
 0xe96   : > { %v2189_v7 = vmul.f32 %v2684_v4, %v2171_v54 }
 0xe97   : > { %v2686_v5 = vpop.eup %2685 }
 0xe98   : > { %v2188_v6 = vmul.f32 %v2686_v5, %v2166_v57 }
 0xe9a   : > { %2612 = vmatprep.mubr.f32.mxu0 %v2188_v6 }
 0xe9b   : > { %2613 = vmatmul.mubr.f32.vlgmr.msra.gmra.mxu0 %v2189_v7 }
 0xf5b   : > { %v2614_v9 = vpop.f32.mrf.mxu0 }
 0xf5c   : > { %v2285_v10 = vadd.f32 %v2614_v9, %v2396_v8 }
 0xf5d   : > { %v2279_v11 = vpop.f32.mrf.mxu0 }
 0xf5e   : > { %v2280_v1 = vadd.f32 %v2396_v8, %v2279_v11  ;;  %v2289_v0 = vadd.f32 %v2285_v10, %v2984_v3 }
 0xf60   : > { %v2288_v12 = vadd.f32 %v2280_v1, %v2987_v43  ;;  %2291 = vst.msk [vmem:[%s442_s19 + $0x8] sm:$0xff] %vm448_vm0, %v2289_v0 }
 0xf62   : > { %2290 = vst.msk [vmem:[%s442_s19] sm:$0xff] %vm448_vm0, %v2288_v12 }
 0xf63 PF: > { %s23_s25 = sadd.s32 1, %s2693_s25  }
 0xf64   : > { %p20_p4 = scmp.ge.s32.totalorder %s23_s25, 6  }
 0xf66   :  { %22 = sbr.rel (!%p20_p4) target bundleno = 1 (0x1), region = 102 }

</bundles_post_ra>
